<compile_context>
chip_gen: v5e
topology: v5e:2x2
jax: 0.10.0
libtpu: 0.0.40
codegen_flags: <defaults>
</compile_context>

<pallas_src>
import functools

import jax
import jax.numpy as jnp
from jax import lax
from jax.experimental import pallas as pl
from jax.experimental.pallas import tpu as pltpu


_PREFERRED_BATCH_TILE = 512   # sweep 512-1024; multiple of 8 and 128
_MIN_BATCH_TILE = 128
_GRID_THRESHOLD = 128         # batches >= this use the tiled/pipelined path


# ----------------------------------------------------------------------------
# Fused Pallas kernel: whole MLP forward in one invocation.
# ----------------------------------------------------------------------------
def _mlp_fused_kernel(*refs, n_inputs, n_layers, n_heads, head_segments):
    """Fused MLP forward.

    refs layout (all VMEM-resident):
      [x_0 .. x_{n_inputs-1},                          inputs
       w0_0 .. w0_{n_inputs-1}, b0,                    input layer (weight split per input)
       w_1, b_1, ..., w_{n_layers-1}, b_{n_layers-1},  hidden trunk layers
       w_head, b_head,                                 merged (lane-dense padded) heads
       out_0 .. out_{n_heads-1}]                       one narrow output per head

    head_segments: static tuple of (start_col, end_col, act_name) for each head
    inside the padded head-matmul result.
    """
    out_refs = refs[len(refs) - n_heads:]
    idx = 0
    xs = [refs[idx + i][...] for i in range(n_inputs)]
    idx += n_inputs

    # --- input layer: sum of per-input dots (replaces wrapper-side concat) ---
    acc = jnp.dot(xs[0], refs[idx][...], preferred_element_type=jnp.float32)
    for i in range(1, n_inputs):
        acc = acc + jnp.dot(xs[i], refs[idx + i][...],
                            preferred_element_type=jnp.float32)
    idx += n_inputs
    h = jnp.maximum(acc + refs[idx][...], 0.0)  # bias is (1, H); broadcasts
    idx += 1

    # --- hidden trunk layers (fully unrolled; weights stay in VMEM) ---
    # TODO(synk): if batch tiles / hidden_size grow enough to become compute-bound,
    # switch the trunk to feature-major ([hidden, B_tile], batch on lanes) so vregs
    # and the MXU N-dimension are fully utilized at hidden_size=32.
    for _ in range(n_layers - 1):
        w = refs[idx][...]
        b = refs[idx + 1][...]
        idx += 2
        h = jnp.maximum(jnp.dot(h, w, preferred_element_type=jnp.float32) + b, 0.0)

    # --- merged output heads: one lane-dense matmul, then per-head narrow stores ---
    wh = refs[idx][...]       # [H, OUT_PAD]
    bh = refs[idx + 1][...]   # [1, OUT_PAD]
    y = jnp.dot(h, wh, preferred_element_type=jnp.float32) + bh   # [tile, OUT_PAD]

    for hi, (start, end, act) in enumerate(head_segments):
        seg = y[:, start:end]                       # static slice, head's real width
        if act == "tanh":                           # EUP; only over the narrow slice
            seg = jnp.tanh(seg)
        elif act == "relu":
            seg = jnp.maximum(seg, 0.0)
        elif act != "none":
            raise ValueError(f"unsupported head activation: {act}")
        out_refs[hi][...] = seg.astype(out_refs[hi].dtype)


# ----------------------------------------------------------------------------
# Parameter construction (PyTorch-Linear-style init) + packing for the kernel.
# ----------------------------------------------------------------------------
def init_linear_params(key, fan_in, fan_out):
    """uniform(-1/sqrt(fan_in), 1/sqrt(fan_in)); weight already as [in, out] (= torch W.T)."""
    kw, kb = jax.random.split(key)
    bound = 1.0 / jnp.sqrt(jnp.float32(fan_in))
    w = jax.random.uniform(kw, (fan_in, fan_out), jnp.float32, -bound, bound)
    b = jax.random.uniform(kb, (fan_out,), jnp.float32, -bound, bound)
    return w, b


def init_mlp_params(key, n_in, n_out, n_hidden, hidden_size):
    params = {"trunk": [], "heads": []}
    key, sub = jax.random.split(key)
    params["trunk"].append(init_linear_params(sub, sum(n_in), hidden_size))
    for _ in range(n_hidden):
        key, sub = jax.random.split(key)
        params["trunk"].append(init_linear_params(sub, hidden_size, hidden_size))
    for d_out in n_out:
        key, sub = jax.random.split(key)
        params["heads"].append(init_linear_params(sub, hidden_size, d_out))
    return params


def pack_mlp_params(params, n_in, n_out, out_fn_names):
    """One-time repack of parameters into the fused-kernel layout."""
    w0, b0 = params["trunk"][0]
    # Split the first-layer weight by input feature sizes (kernel sums per-input dots).
    w0_splits, off = [], 0
    for d in n_in:
        w0_splits.append(w0[off:off + d, :])
        off += d

    hidden = [(w, b.reshape(1, -1)) for (w, b) in params["trunk"][1:]]

    # Merge head weights/biases along Dout and zero-pad to a lane-dense width.
    # (Padding is for the in-kernel matmul only; padded columns are never stored.)
    head_w = jnp.concatenate([w for (w, _) in params["heads"]], axis=1)
    head_b = jnp.concatenate([b for (_, b) in params["heads"]], axis=0)
    d_out_total = head_w.shape[1]
    out_pad = max(128, ((d_out_total + 127) // 128) * 128)
    pad = out_pad - d_out_total
    if pad:
        head_w = jnp.pad(head_w, ((0, 0), (0, pad)))
        head_b = jnp.pad(head_b, ((0, pad),))

    segments, off = [], 0
    for d, act in zip(n_out, out_fn_names):
        segments.append((off, off + d, act))
        off += d

    return {
        "w0_splits": tuple(w0_splits),
        "b0": b0.reshape(1, -1),
        "hidden": tuple(hidden),
        "head_w": head_w,
        "head_b": head_b.reshape(1, -1),
        "head_segments": tuple(segments),
        "n_out": tuple(n_out),
        "out_pad": out_pad,
    }


def _pick_batch_tile(B):
    """Largest tile <= preferred that keeps >=2 grid steps when B allows it (v7x 2 TCs)."""
    if B < 2 * _MIN_BATCH_TILE:
        return _MIN_BATCH_TILE
    half = (B // 2) // _MIN_BATCH_TILE * _MIN_BATCH_TILE
    return max(_MIN_BATCH_TILE, min(_PREFERRED_BATCH_TILE, half))


def _cost_estimate(B, n_in, hidden_size, n_layers, out_pad, head_segments, param_bytes):
    flops_per_row = 2 * (sum(n_in) * hidden_size
                         + (n_layers - 1) * hidden_size * hidden_size
                         + hidden_size * out_pad)
    transc_per_row = sum((e - s) for (s, e, act) in head_segments if act == "tanh")
    d_out_total = sum((e - s) for (s, e, _) in head_segments)
    bytes_accessed = 4 * B * (sum(n_in) + d_out_total) + param_bytes
    return pl.CostEstimate(flops=B * flops_per_row,
                           transcendentals=B * transc_per_row,
                           bytes_accessed=bytes_accessed)


# ----------------------------------------------------------------------------
# Forward pass: one pallas_call for the whole network.
# ----------------------------------------------------------------------------
def mlp_forward(packed, *inputs):
    B = inputs[0].shape[0]
    n_inputs = len(inputs)
    n_layers = 1 + len(packed["hidden"])
    n_heads = len(packed["n_out"])
    hidden_size = packed["b0"].shape[1]

    args = list(inputs) + list(packed["w0_splits"]) + [packed["b0"]]
    for (w, b) in packed["hidden"]:
        args += [w, b]
    args += [packed["head_w"], packed["head_b"]]

    param_bytes = sum(int(a.size) * 4 for a in args[n_inputs:])
    cost = _cost_estimate(B, tuple(x.shape[1] for x in inputs), hidden_size,
                          n_layers, packed["out_pad"], packed["head_segments"],
                          param_bytes)

    kernel = functools.partial(
        _mlp_fused_kernel,
        n_inputs=n_inputs,
        n_layers=n_layers,
        n_heads=n_heads,
        head_segments=packed["head_segments"],
    )

    out_shapes = tuple(jax.ShapeDtypeStruct((B, d), jnp.float32)
                       for d in packed["n_out"])

    if B >= _GRID_THRESHOLD:
        # Large-batch path: cdiv grid over the batch (last block masked), batch
        # axis "parallel" (megacore on v7x), weights whole & VMEM-resident.
        tile = _pick_batch_tile(B)
        grid = (pl.cdiv(B, tile),)
        in_specs = []
        for x in inputs:
            d = x.shape[1]
            in_specs.append(pl.BlockSpec((tile, d), lambda i: (i, 0)))
        for a in args[n_inputs:]:
            r, c = a.shape
            in_specs.append(pl.BlockSpec((r, c), lambda i: (0, 0)))
        out_specs = [pl.BlockSpec((tile, d), lambda i: (i, 0))
                     for d in packed["n_out"]]
        outs = pl.pallas_call(
            kernel,
            out_shape=out_shapes,
            grid=grid,
            in_specs=in_specs,
            out_specs=out_specs,
            compiler_params=pltpu.CompilerParams(
                dimension_semantics=("parallel",)),
            cost_estimate=cost,
        )(*args)
    else:
        # Small-batch path: no grid, whole-array VMEM blocks, single invocation.
        outs = pl.pallas_call(
            kernel,
            out_shape=out_shapes,
            in_specs=[pl.BlockSpec(memory_space=pltpu.MemorySpace.VMEM)] * len(args),
            out_specs=[pl.BlockSpec(memory_space=pltpu.MemorySpace.VMEM)] * n_heads,
            cost_estimate=cost,
        )(*args)

    outs = list(outs)
    return outs[0] if len(outs) == 1 else outs

    # TODO(synk): if hidden_size is ever raised to >=256, cast x/W to bf16 for the
    # dots (keep preferred_element_type=f32, keep elementwise in f32 for v5e) and
    # re-budget VMEM against v7x's 64 MiB via pltpu.CompilerParams(vmem_limit_bytes=...).


# Pure-JAX reference for correctness checks.
def mlp_forward_ref(params, out_fn_names, *inputs):
    x = jnp.concatenate(inputs, axis=-1) if len(inputs) > 1 else inputs[0]
    for (w, b) in params["trunk"]:
        x = jnp.maximum(x @ w + b, 0.0)
    outs = []
    for (w, b), act in zip(params["heads"], out_fn_names):
        y = x @ w + b
        if act == "tanh":
            y = jnp.tanh(y)
        elif act == "relu":
            y = jnp.maximum(y, 0.0)
        outs.append(y)
    return outs[0] if len(outs) == 1 else outs


if __name__ == "__main__":
    # Module hyperparameters (small, consistent with the PyTorch module).
    n_in = (4, 4)                      # two inputs, concatenated -> 8 features
    n_out = (3, 1)                     # two output heads
    n_hidden = 2                       # two hidden Linear+ReLU layers after the input layer
    hidden_size = 32
    out_fn_names = ("tanh", "none")    # out_fns = (torch.tanh, lambda x: x)

    key = jax.random.PRNGKey(0)
    kp, k1, k2, k3, k4 = jax.random.split(key, 5)
    params = init_mlp_params(kp, n_in, n_out, n_hidden, hidden_size)
    packed = pack_mlp_params(params, n_in, n_out, out_fn_names)

    # --- small batch (single fused invocation, no grid) ---
    batch = 2
    x1 = jax.random.normal(k1, (batch, n_in[0]), jnp.float32)
    x2 = jax.random.normal(k2, (batch, n_in[1]), jnp.float32)
    outs = jax.block_until_ready(mlp_forward(packed, x1, x2))
    refs = mlp_forward_ref(params, out_fn_names, x1, x2)
    for o, r in zip(outs, refs):
        assert o.shape == r.shape
        assert jnp.max(jnp.abs(o - r)) < 1e-4

    # --- larger, NON-multiple-of-128 batch exercises the cdiv grid + masked last tile ---
    batch_big = 1000
    x1b = jax.random.normal(k3, (batch_big, n_in[0]), jnp.float32)
    x2b = jax.random.normal(k4, (batch_big, n_in[1]), jnp.float32)
    outs_b = jax.block_until_ready(mlp_forward(packed, x1b, x2b))
    refs_b = mlp_forward_ref(params, out_fn_names, x1b, x2b)
    for o, r in zip(outs_b, refs_b):
        assert o.shape == r.shape
        assert jnp.max(jnp.abs(o - r)) < 1e-4

    print("KERNEL_OK")
</pallas_src>

<mosaic_0001>
module attributes {stable_mosaic.version = 11 : i64} {
  func.func @_mlp_fused_kernel(%arg0: memref<2x4xf32, #tpu.memory_space<vmem>>, %arg1: memref<2x4xf32, #tpu.memory_space<vmem>>, %arg2: memref<4x32xf32, #tpu.memory_space<vmem>>, %arg3: memref<4x32xf32, #tpu.memory_space<vmem>>, %arg4: memref<1x32xf32, #tpu.memory_space<vmem>>, %arg5: memref<32x32xf32, #tpu.memory_space<vmem>>, %arg6: memref<1x32xf32, #tpu.memory_space<vmem>>, %arg7: memref<32x32xf32, #tpu.memory_space<vmem>>, %arg8: memref<1x32xf32, #tpu.memory_space<vmem>>, %arg9: memref<32x128xf32, #tpu.memory_space<vmem>>, %arg10: memref<1x128xf32, #tpu.memory_space<vmem>>, %arg11: memref<2x3xf32, #tpu.memory_space<vmem>>, %arg12: memref<2x1xf32, #tpu.memory_space<vmem>>) attributes {dimension_semantics = [], scalar_prefetch = 0 : i64, scratch_operands = 0 : i64, tpu.core_type = #tpu.core_type<tc>} {
    %c0 = arith.constant 0 : index
    %c0_0 = arith.constant 0 : index
    %0 = vector.load %arg0[%c0, %c0_0] : memref<2x4xf32, #tpu.memory_space<vmem>>, vector<2x4xf32>
    %c0_1 = arith.constant 0 : index
    %c0_2 = arith.constant 0 : index
    %1 = vector.load %arg1[%c0_1, %c0_2] : memref<2x4xf32, #tpu.memory_space<vmem>>, vector<2x4xf32>
    %c0_3 = arith.constant 0 : index
    %c0_4 = arith.constant 0 : index
    %2 = vector.load %arg2[%c0_3, %c0_4] : memref<4x32xf32, #tpu.memory_space<vmem>>, vector<4x32xf32>
    %cst = arith.constant dense<0.000000e+00> : vector<2x32xf32>
    %3 = tpu.matmul %0, %2, %cst {dimension_numbers = #tpu.dot_dimension_numbers<[1], [0], [0], [1], [0, 0, 1, 1], [], []>} : vector<2x4xf32>, vector<4x32xf32>, vector<2x32xf32> -> vector<2x32xf32>
    %c0_5 = arith.constant 0 : index
    %c0_6 = arith.constant 0 : index
    %4 = vector.load %arg3[%c0_5, %c0_6] : memref<4x32xf32, #tpu.memory_space<vmem>>, vector<4x32xf32>
    %cst_7 = arith.constant dense<0.000000e+00> : vector<2x32xf32>
    %5 = tpu.matmul %1, %4, %cst_7 {dimension_numbers = #tpu.dot_dimension_numbers<[1], [0], [0], [1], [0, 0, 1, 1], [], []>} : vector<2x4xf32>, vector<4x32xf32>, vector<2x32xf32> -> vector<2x32xf32>
    %6 = arith.addf %3, %5 : vector<2x32xf32>
    %c0_8 = arith.constant 0 : index
    %c0_9 = arith.constant 0 : index
    %7 = vector.load %arg4[%c0_8, %c0_9] : memref<1x32xf32, #tpu.memory_space<vmem>>, vector<1x32xf32>
    %8 = vector.broadcast %7 : vector<1x32xf32> to vector<2x32xf32>
    %9 = arith.addf %6, %8 : vector<2x32xf32>
    %cst_10 = arith.constant 0.000000e+00 : f32
    %10 = vector.broadcast %cst_10 : f32 to vector<2x32xf32>
    %11 = arith.maximumf %9, %10 : vector<2x32xf32>
    %c0_11 = arith.constant 0 : index
    %c0_12 = arith.constant 0 : index
    %12 = vector.load %arg5[%c0_11, %c0_12] : memref<32x32xf32, #tpu.memory_space<vmem>>, vector<32x32xf32>
    %c0_13 = arith.constant 0 : index
    %c0_14 = arith.constant 0 : index
    %13 = vector.load %arg6[%c0_13, %c0_14] : memref<1x32xf32, #tpu.memory_space<vmem>>, vector<1x32xf32>
    %cst_15 = arith.constant dense<0.000000e+00> : vector<2x32xf32>
    %14 = tpu.matmul %11, %12, %cst_15 {dimension_numbers = #tpu.dot_dimension_numbers<[1], [0], [0], [1], [0, 0, 1, 1], [], []>} : vector<2x32xf32>, vector<32x32xf32>, vector<2x32xf32> -> vector<2x32xf32>
    %15 = vector.broadcast %13 : vector<1x32xf32> to vector<2x32xf32>
    %16 = arith.addf %14, %15 : vector<2x32xf32>
    %cst_16 = arith.constant 0.000000e+00 : f32
    %17 = vector.broadcast %cst_16 : f32 to vector<2x32xf32>
    %18 = arith.maximumf %16, %17 : vector<2x32xf32>
    %c0_17 = arith.constant 0 : index
    %c0_18 = arith.constant 0 : index
    %19 = vector.load %arg7[%c0_17, %c0_18] : memref<32x32xf32, #tpu.memory_space<vmem>>, vector<32x32xf32>
    %c0_19 = arith.constant 0 : index
    %c0_20 = arith.constant 0 : index
    %20 = vector.load %arg8[%c0_19, %c0_20] : memref<1x32xf32, #tpu.memory_space<vmem>>, vector<1x32xf32>
    %cst_21 = arith.constant dense<0.000000e+00> : vector<2x32xf32>
    %21 = tpu.matmul %18, %19, %cst_21 {dimension_numbers = #tpu.dot_dimension_numbers<[1], [0], [0], [1], [0, 0, 1, 1], [], []>} : vector<2x32xf32>, vector<32x32xf32>, vector<2x32xf32> -> vector<2x32xf32>
    %22 = vector.broadcast %20 : vector<1x32xf32> to vector<2x32xf32>
    %23 = arith.addf %21, %22 : vector<2x32xf32>
    %cst_22 = arith.constant 0.000000e+00 : f32
    %24 = vector.broadcast %cst_22 : f32 to vector<2x32xf32>
    %25 = arith.maximumf %23, %24 : vector<2x32xf32>
    %c0_23 = arith.constant 0 : index
    %c0_24 = arith.constant 0 : index
    %26 = vector.load %arg9[%c0_23, %c0_24] : memref<32x128xf32, #tpu.memory_space<vmem>>, vector<32x128xf32>
    %c0_25 = arith.constant 0 : index
    %c0_26 = arith.constant 0 : index
    %27 = vector.load %arg10[%c0_25, %c0_26] : memref<1x128xf32, #tpu.memory_space<vmem>>, vector<1x128xf32>
    %cst_27 = arith.constant dense<0.000000e+00> : vector<2x128xf32>
    %28 = tpu.matmul %25, %26, %cst_27 {dimension_numbers = #tpu.dot_dimension_numbers<[1], [0], [0], [1], [0, 0, 1, 1], [], []>} : vector<2x32xf32>, vector<32x128xf32>, vector<2x128xf32> -> vector<2x128xf32>
    %29 = vector.broadcast %27 : vector<1x128xf32> to vector<2x128xf32>
    %30 = arith.addf %28, %29 : vector<2x128xf32>
    %31 = vector.extract_strided_slice %30 {offsets = [0, 0], sizes = [2, 3], strides = [1, 1]} : vector<2x128xf32> to vector<2x3xf32>
    %32 = math.tanh %31 : vector<2x3xf32>
    %c0_28 = arith.constant 0 : index
    %c0_29 = arith.constant 0 : index
    %33 = vector.load %arg11[%c0_28, %c0_29] : memref<2x3xf32, #tpu.memory_space<vmem>>, vector<2x3xf32>
    tpu.vector_store %arg11[%c0_28, %c0_29], %32 {strides = array<i32>} : memref<2x3xf32, #tpu.memory_space<vmem>>, vector<2x3xf32>,
    %34 = vector.extract_strided_slice %30 {offsets = [0, 3], sizes = [2, 1], strides = [1, 1]} : vector<2x128xf32> to vector<2x1xf32>
    %c0_30 = arith.constant 0 : index
    %c0_31 = arith.constant 0 : index
    %35 = vector.load %arg12[%c0_30, %c0_31] : memref<2x1xf32, #tpu.memory_space<vmem>>, vector<2x1xf32>
    tpu.vector_store %arg12[%c0_30, %c0_31], %34 {strides = array<i32>} : memref<2x1xf32, #tpu.memory_space<vmem>>, vector<2x1xf32>,
    return
  }
}

</mosaic_0001>

<bundles_post_ra>
// kernel: tpu_custom_call.1
= control target key start
LH: loop header
LB: loop body
LE: loop exit
PB: predicated region body
PF: predicated region fallthrough
CT: control target
= control target key end

     0   :  { %18 = vsyncpa [#allocation3], 0  ;;  %s679_s0 = inlined_call_operand.hbm [shape: f32[2,4], index: 0, kind: input, shape index: {}]   ;;  %s680_s1 = inlined_call_operand.hbm [shape: f32[2,4], index: 1, kind: input, shape index: {}]   ;;  %s681_s2 = inlined_call_operand.hbm [shape: f32[4,32], index: 2, kind: input, shape index: {}]   ;;  %s682_s3 = inlined_call_operand.hbm [shape: f32[4,32], index: 3, kind: input, shape index: {}]   ;;  %s683_s4 = inlined_call_operand.vmem [shape: f32[1,32], index: 4, kind: input, shape index: {}]   ;;  %s684_s5 = inlined_call_operand.hbm [shape: f32[32,32], index: 5, kind: input, shape index: {}]   ;;  %s685_s6 = inlined_call_operand.vmem [shape: f32[1,32], index: 6, kind: input, shape index: {}]   ;;  %s686_s7 = inlined_call_operand.hbm [shape: f32[32,32], index: 7, kind: input, shape index: {}]   ;;  %s687_s8 = inlined_call_operand.vmem [shape: f32[1,32], index: 8, kind: input, shape index: {}]   ;;  %s688_s9 = inlined_call_operand.hbm [shape: f32[32,128], index: 9, kind: input, shape index: {}]   ;;  %s689_s10 = inlined_call_operand.vmem [shape: f32[1,128], index: 10, kind: input, shape index: {}]   ;;  %s690_s11 = inlined_call_operand.hbm [shape: f32[2,3], index: 11, kind: output, shape index: {0}]   ;;  %s691_s12 = inlined_call_operand.vmem [shape: f32[2,1], index: 12, kind: output, shape index: {1}]  }
   0x1   :  { %19 = vsyncpa [#allocation6], 0 }
   0x2   :  { %20 = vsyncpa [#allocation9], 0 }
   0x3   :  { %21 = vsyncpa [#allocation12], 0  ;;  %s39_s23 = sshll.u32 %s680_s1, 4  ;;  %s40_s23 = int_to_ptr.hbm [resolvable:$true] %s39_s23 }
   0x4   :  { %22 = vsyncpa [#allocation4], 0  ;;  %s561_s24 = smov [#allocation5]   ;;  %s61_s28 = sshll.u32 %s682_s3, 4  ;;  %s62_s28 = int_to_ptr.hbm [resolvable:$true] %s61_s28 }
   0x5   :  { %s41_s25 = sshll.u32 %s561_s24, 4  ;;  %s562_s29 = smov [#allocation8]   ;;  %s42_s25 = int_to_ptr.vmem [resolvable:$true] %s41_s25 }
   0x6   :  { %44 = dma.hbm_to_vmem [thread:$0]  %s40_s23, 32, %s42_s25, [#allocation6]  }
   0x7   :  { %s63_s30 = sshll.u32 %s562_s29, 4  ;;  %s88_s15 = sshll.u32 %s686_s7, 4  ;;  %s64_s30 = int_to_ptr.vmem [resolvable:$true] %s63_s30  ;;  %s89_s15 = int_to_ptr.hbm [resolvable:$true] %s88_s15 }
   0x8   :  { %66 = dma.hbm_to_vmem [thread:$0]  %s62_s28, 64, %s64_s30, [#allocation9]  }
   0x9   :  { %s563_s1 = smov [#allocation11]   ;;  %s28_s19 = sshll.u32 %s679_s0, 4  ;;  %s29_s19 = int_to_ptr.hbm [resolvable:$true] %s28_s19 }
   0xa   :  { %s90_s16 = sshll.u32 %s563_s1, 4  ;;  %s564_s20 = smov 128   ;;  %s91_s16 = int_to_ptr.vmem [resolvable:$true] %s90_s16 }
   0xb   :  { %s565_s3 = smov 8   ;;  %s566_s21 = smov [#allocation2]  }
   0xc   :  { %96 = dma.hbm_to_vmem [thread:$0]  %s89_s15, 512, %s91_s16, [#allocation12], %s564_s20, %s564_s20, %s565_s3  }
   0xd   :  { %s30_s22 = sshll.u32 %s566_s21, 4  ;;  %s50_s25 = sshll.u32 %s681_s2, 4  ;;  %s31_s22 = int_to_ptr.vmem [resolvable:$true] %s30_s22  ;;  %s51_s25 = int_to_ptr.hbm [resolvable:$true] %s50_s25 }
   0xe   :  { %33 = dma.hbm_to_vmem [thread:$0]  %s29_s19, 32, %s31_s22, [#allocation3]  }
   0xf   :  { %s73_s27 = sshll.u32 %s684_s5, 4  ;;  %s567_s28 = smov [#allocation7]   ;;  %s74_s27 = int_to_ptr.hbm [resolvable:$true] %s73_s27 }
  0x10   :  { %s52_s29 = sshll.u32 %s567_s28, 4  ;;  %s568_s0 = smov [#allocation10]   ;;  %s53_s29 = int_to_ptr.vmem [resolvable:$true] %s52_s29 }
  0x11   :  { %55 = dma.hbm_to_vmem [thread:$0]  %s51_s25, 64, %s53_s29, [#allocation6]  }
  0x12   :  { %s75_s30 = sshll.u32 %s568_s0, 4  ;;  %s103_s15 = sshll.u32 %s688_s9, 4  ;;  %s76_s30 = int_to_ptr.vmem [resolvable:$true] %s75_s30  ;;  %s104_s15 = int_to_ptr.hbm [resolvable:$true] %s103_s15 }
  0x13   :  { %81 = dma.hbm_to_vmem [thread:$0]  %s74_s27, 512, %s76_s30, [#allocation9], %s564_s20, %s564_s20, %s565_s3  }
  0x14   :  { %s569_s2 = smov [#allocation13]  }
  0x15   :  { %s105_s1 = sshll.u32 %s569_s2, 4  ;;  %s106_s1 = int_to_ptr.vmem [resolvable:$true] %s105_s1 }
  0x16   :  { %111 = dma.hbm_to_vmem [thread:$0]  %s104_s15, 512, %s106_s1, [#allocation12], %s564_s20, %s564_s20, %s565_s3  }
  0x17   :  { %551 = dma.done.wait [#allocation3], 32  }
  0x18   :  { %552 = vsyncadd [#allocation3], 4294967264 }
  0x19   :  { %553 = dma.done.wait [#allocation6], 96  }
  0x1a   :  { %554 = vsyncadd [#allocation6], 4294967200 }
  0x1b   :  { %555 = dma.done.wait [#allocation9], 576  }
  0x1c   :  { %556 = vsyncadd [#allocation9], 4294966720 }
  0x1d   :  { %557 = dma.done.wait [#allocation12], 1024  }
  0x1e   :  { %558 = vsyncadd [#allocation12], 4294966272  ;;  %vm150_vm0 = vcmask 1043456   ;;  %vm146_vm1 = vcmask 31744   ;;  %v145_v0 = vld [vmem:[#allocation8] sm:$0xf] }
  0x1f   :  { %v144_v1 = vld [vmem:[#allocation7] sm:$0xf]  ;;  %v143_v2 = vld [vmem:[#allocation5] sm:$0x3]  ;;  %335 = vmatpush.msk.msra.mxu0 %vm150_vm0, %v145_v0  ;;  %v142_v3 = vld [vmem:[#allocation2] sm:$0x3] }
  0x20   :  { %337 = vmatpush.msk.msra.mxu1 %vm150_vm0, %v144_v1  ;;  %336 = vmatmul.msk.f32.vlgmr.msra.gmra.mxu0 %vm146_vm1, %v143_v2  ;;  %v209_v4 = vld [vmem:[#allocation10 + $0x18] sm:$0xff]  ;;  %v208_v5 = vld [vmem:[#allocation10 + $0x10] sm:$0xff]  ;;  %v207_v6 = vld [vmem:[#allocation10 + $0x8] sm:$0xff]  ;;  %vm214_vm2 = vcmask 261120   ;;  %s570_s20 = smov 125   ;;  %s571_s3 = smov [#allocation14]  }
  0x21   :  { %338 = vmatmul.msk.f32.vlgmr.msra.gmra.mxu1 %vm146_vm1, %v142_v3  ;;  %230 = vmatpush.msra.mxu2 %v209_v4  ;;  %v206_v7 = vld [vmem:[#allocation10] sm:$0xff]  ;;  %v242_v8 = vld [vmem:[#allocation11 + $0x18] sm:$0xff]  ;;  %v353_v9 = vld [vmem:[%s683_s4] ss:$0 sm:$0xff]  ;;  %s316_s21 = sshll.u32 %s571_s3, 4  ;;  %vm303_vm3 = vcmask 17408   ;;  %s317_s21 = int_to_ptr.vmem [resolvable:$true] %s316_s21 }
  0x22   :  { %262 = vmatpush.msra.mxu3 %v242_v8  ;;  %v241_v15 = vld [vmem:[#allocation11 + $0x10] sm:$0xff]  ;;  %v240_v16 = vld [vmem:[#allocation11 + $0x8] sm:$0xff]  ;;  %v239_v17 = vld [vmem:[#allocation11] sm:$0xff]  ;;  %vm309_vm4 = vcmask 1024  }
  0x23   :  { %231 = vmatpush.msra.mxu2 %v208_v5  ;;  %v274_v18 = vld [vmem:[#allocation13 + $0x18] sm:$0xff]  ;;  %v273_v19 = vld [vmem:[#allocation13 + $0x10] sm:$0xff]  ;;  %v272_v24 = vld [vmem:[#allocation13 + $0x8] sm:$0xff] }
  0x24   :  { %263 = vmatpush.msra.mxu3 %v241_v15  ;;  %294 = vmatpush.msrb.mxu0 %v274_v18  ;;  %v354_v20 = vld [vmem:[%s685_s6] ss:$0 sm:$0xff]  ;;  %v271_v25 = vld [vmem:[#allocation13] sm:$0xff] }
  0x25   :  { %232 = vmatpush.msra.mxu2 %v207_v6  ;;  %v355_v26 = vld [vmem:[%s687_s8] ss:$0 sm:$0xff]  ;;  %s318_s8 = sshll.u32 %s690_s11, 4  ;;  %s319_s8 = int_to_ptr.hbm [resolvable:$true] %s318_s8 }
  0x26   :  { %264 = vmatpush.msra.mxu3 %v240_v16  ;;  %295 = vmatpush.msrb.mxu0 %v273_v19  ;;  %v356_v30 = vld [vmem:[%s689_s10] ss:$0 sm:$0xff] }
  0x27   :  { %233 = vmatpush.msra.mxu2 %v206_v7 }
  0x28   :  { %265 = vmatpush.msra.mxu3 %v239_v17  ;;  %296 = vmatpush.msrb.mxu0 %v272_v24 }
  0x2a   :  { %297 = vmatpush.msrb.mxu0 %v271_v25 }
  0x9d   :  { %v171_v10 = vpop.f32.mrf.mxu0 }
  0x9e   :  { %v197_v11 = vpop.f32.mrf.mxu1 }
  0x9f   :  { %v198_v12 = vadd.f32 %v197_v11, %v171_v10 }
  0xa1   :  { %v204_v13 = vadd.f32 %v353_v9, %v198_v12 }
  0xa3   :  { %v205_v14 = vmax.f32 %v204_v13, 0.0 }
  0xa5   :  { %339 = vmatmul.msk.f32.vlgmr.msra.gmra.mxu2 %vm214_vm2, %v205_v14 }
 0x128   :  { %v235_v21 = vpop.f32.mrf.mxu2 }
 0x129   :  { %v236_v22 = vadd.f32 %v354_v20, %v235_v21 }
 0x12b   :  { %v238_v23 = vmax.f32 %v236_v22, 0.0 }
 0x12d   :  { %340 = vmatmul.msk.f32.vlgmr.msra.gmra.mxu3 %vm214_vm2, %v238_v23 }
 0x1b0   :  { %v267_v27 = vpop.f32.mrf.mxu3 }
 0x1b1   :  { %v268_v28 = vadd.f32 %v355_v26, %v267_v27 }
 0x1b3   :  { %v270_v29 = vmax.f32 %v268_v28, 0.0 }
 0x1b5   :  { %341 = vmatmul.msk.f32.vlgmr.msrb.gmra.mxu0 %vm214_vm2, %v270_v29 }
 0x232   :  { %v299_v31 = vpop.f32.mrf.mxu0 }
 0x233   :  { %v300_v32 = vadd.f32 %v356_v30, %v299_v31 }
 0x235   :  { %357 = vtanh.f32 %v300_v32  ;;  %306 = vrot.lane.b32.xlu0 %v300_v32, %s570_s20 }
 0x23b   :  { %v358_v33 = vpop.eup %357 }
 0x23c   :  { %304 = vst.msk [vmem:[#allocation14] sm:$0x3] %vm303_vm3, %v358_v33 }
 0x23d   :  { %321 = dma.vmem_to_hbm [thread:$0]  %s317_s21, 32, %s319_s8, [#allocation4]  }
 0x2a7   :  { %v307_v34 = vpop.permute.xlu0 %306 }
 0x2a8   :  { %310 = vst.msk [vmem:[%s691_s12] sm:$0x3] %vm309_vm4, %v307_v34 }
 0x2a9   :  { %559 = dma.done.wait [#allocation4], 32  }
 0x2aa   :  { %560 = vsyncadd [#allocation4], 4294967264 }
 0x2ab   :  { %330 = vsyncpa [#allocation3], 1 }
 0x2ac   :  { %331 = vsyncpa [#allocation6], 1 }
 0x2ad   :  { %332 = vsyncpa [#allocation9], 1 }
 0x2ae   :  { %333 = vsyncpa [#allocation12], 1 }
 0x2af   :  { %334 = vsyncpa [#allocation4], 1 }

</bundles_post_ra>
